<compile_context>
chip_gen: v7x
topology: tpu7x:2x2x1
jax: 0.10.0
libtpu: 0.0.40
codegen_flags: <defaults>
</compile_context>

<pallas_src>
import functools

import jax
import jax.numpy as jnp
from jax.experimental import pallas as pl
from jax.experimental.pallas import tpu as pltpu

_EPS = 1e-12                 # matches torch.nn.functional.normalize default eps
_EPS_SQ = _EPS * _EPS        # clamp on the sum-of-squares (rsqrt(max(ss, eps^2)))
_NEG_BIG = -1e30             # effectively -inf for masked logits (f32 accumulator)
_OUT_LANES = 128             # lane-dense per-sample loss block width


def _round_up(x, m):
    return ((x + m - 1) // m) * m


def _cdiv(a, b):
    return -(-a // b)


def _vmem_config():
    """Generation-aware (vmem_limit_bytes, tile-budget bytes)."""
    try:
        cap = int(pltpu.get_tpu_info().vmem_capacity_bytes)
        # ~48 MiB on v7x (64 MiB physical per TC), ~96 MiB on v5e/v6e (128 MiB).
        limit = min((cap * 3) // 4, 96 << 20)
        return limit, (limit * 3) // 4
    except Exception:
        # Unknown chip: keep the default scoped-VMEM limit, tile conservatively.
        return None, 12 << 20


# ---------------------------------------------------------------------------
# Tile selection (host-side, static)
# ---------------------------------------------------------------------------
def _inbatch_bytes(tq, tk, d, itemsize):
    io = 2 * 2 * tq * d * itemsize          # q + p blocks, double-buffered
    io += 2 * tk * d * itemsize             # key block, double-buffered
    io += 2 * tq * _OUT_LANES * 4           # output block, double-buffered
    io += 2 * 8 * max(tk, 128) * 4          # key inv-norm row (sublane/lane padded)
    tmp = 2 * tq * tk * 4                   # sim + exp(sim) f32 temporaries
    scr = 4 * tq * 128 * 4                  # four (tq, 1) f32 scratch (lane padded)
    return io + tmp + scr


def _inbatch_tiling(b, d, itemsize, budget):
    b8 = _round_up(b, 8)
    # >= 2 query tiles when possible (both v7x TensorCores get work); otherwise
    # ~512-row query tiles to amortize repeated key reads and per-step overhead.
    n_q = 1 if b8 <= 8 else max(2, _cdiv(b8, 512))
    tq = _round_up(_cdiv(b8, n_q), 8)
    while tq > 8 and _inbatch_bytes(tq, min(tq, 256), d, itemsize) > budget:
        tq = _round_up(_cdiv(tq, 2), 8)
    b_pad = _round_up(b8, tq)

    # Key tile: 256 fills the MXU output width (v6e/v7x); 128 for awkward batch
    # sizes; otherwise keep all keys in a single block (small/medium batches).
    # tile_k must be 128-aligned or full so the (1, tile_k) inv-norm input is legal.
    if b_pad > 256 and b_pad % 256 == 0:
        tk = 256
    elif b_pad > 128 and b_pad % 128 == 0:
        tk = 128
    else:
        tk = b_pad
    if tk == b_pad and _inbatch_bytes(tq, tk, d, itemsize) > budget:
        # Huge D with an unaligned batch: force 128-aligned tiles instead of a
        # single giant key block.
        tq = _round_up(tq, 128)
        b_pad = _round_up(b8, tq)
        tk = 256 if b_pad % 256 == 0 else 128
    return tq, tk, b_pad


def _explicit_bytes(tb, tn, d, itemsize):
    io = 2 * 2 * tb * d * itemsize                 # anchor + positive blocks
    io += 2 * tb * tn * d * itemsize               # negatives chunk, double-buffered
    io += 2 * tb * _OUT_LANES * 4                  # output block
    tmp = 3 * tb * tn * d * 4                      # f32 cast + product + square temps
    tmp += 2 * tb * max(tn, 128) * 4               # sim / exp temporaries
    scr = 4 * tb * 128 * 4                         # scratch (lane padded)
    return io + tmp + scr


def _explicit_tiling(b, n, d, itemsize, budget):
    b8 = _round_up(b, 8)
    # Chunk the negatives along N (inner "arbitrary" axis) so live f32
    # temporaries stay bounded; a full-N block is used when N is small.
    if n <= 256:
        tn = n
    else:
        tn = _round_up(_cdiv(n, _cdiv(n, 256)), 8)
    while tn > 8 and _explicit_bytes(8, tn, d, itemsize) > budget:
        tn = _round_up(_cdiv(tn, 2), 8)
    n_pad = n if tn == n else _round_up(n, tn)

    n_b = 1 if b8 <= 8 else max(2, _cdiv(b8, 512))
    tb = _round_up(_cdiv(b8, n_b), 8)
    while tb > 8 and _explicit_bytes(tb, tn, d, itemsize) > budget:
        tb = _round_up(_cdiv(tb, 2), 8)
    b_pad = _round_up(b8, tb)
    return tb, tn, b_pad, n_pad


# ---------------------------------------------------------------------------
# Kernels
# ---------------------------------------------------------------------------
def _infonce_inbatch_kernel(q_ref, p_ref, k_ref, kinv_ref, out_ref,
                            qscale_sc, pos_sc, m_sc, l_sc,
                            *, tau_inv, batch, tile_q, tile_k, mask_pad):
    """negatives=None branch: other in-batch samples act as negatives.

    Grid = (num_q_tiles [parallel], num_k_tiles [arbitrary]); online logsumexp
    over key tiles; the positive term is folded into the running (m, l) state.
    Keys stay in their raw input dtype; normalization + 1/tau are row/column
    post-scales of the f32 similarity tile.
    """
    qi = pl.program_id(0)
    ki = pl.program_id(1)
    nk = pl.num_programs(1)

    @pl.when(ki == 0)
    def _init():
        q32 = q_ref[...].astype(jnp.float32)
        p32 = p_ref[...].astype(jnp.float32)
        q_inv = jax.lax.rsqrt(
            jnp.maximum(jnp.sum(q32 * q32, axis=1, keepdims=True), _EPS_SQ))
        p_inv = jax.lax.rsqrt(
            jnp.maximum(jnp.sum(p32 * p32, axis=1, keepdims=True), _EPS_SQ))
        q_scale = q_inv * tau_inv                      # fold 1/tau into the row scale
        pos = jnp.sum(q32 * p32, axis=1, keepdims=True) * q_scale * p_inv
        qscale_sc[...] = q_scale
        pos_sc[...] = pos
        m_sc[...] = pos                                # positive term seeds the LSE
        l_sc[...] = jnp.ones_like(l_sc)

    # Raw (input-dtype) operands feed the MXU; contract D, no explicit transpose.
    sim = jax.lax.dot_general(
        q_ref[...], k_ref[...],
        dimension_numbers=(((1,), (1,)), ((), ())),
        preferred_element_type=jnp.float32)
    # Row scale 1/(tau*||q||) and column scale 1/||k|| (precomputed in wrapper).
    sim = sim * qscale_sc[...] * kinv_ref[...]

    # Mask the diagonal (positive handled separately); padded key columns are
    # only masked when the batch actually needed padding (static flag).
    row = qi * tile_q + jax.lax.broadcasted_iota(jnp.int32, sim.shape, 0)
    col = ki * tile_k + jax.lax.broadcasted_iota(jnp.int32, sim.shape, 1)
    pred = row == col
    if mask_pad:
        pred = pred | (col >= batch)
    sim = jnp.where(pred, _NEG_BIG, sim)

    # Online logsumexp update (f32 state; exp(-1e30 - m) underflows to 0).
    m_prev = m_sc[...]
    m_new = jnp.maximum(m_prev, jnp.max(sim, axis=1, keepdims=True))
    alpha = jnp.exp(m_prev - m_new)
    l_sc[...] = alpha * l_sc[...] + jnp.sum(jnp.exp(sim - m_new), axis=1,
                                            keepdims=True)
    m_sc[...] = m_new

    @pl.when(ki == nk - 1)
    def _finalize():
        loss = m_sc[...] + jnp.log(l_sc[...]) - pos_sc[...]     # (TILE_Q, 1)
        out_ref[...] = jnp.broadcast_to(loss, out_ref.shape)    # lane-dense store
    # TODO(synk): consider pipeline_mode=pl.Buffered(3) on the key BlockSpec if
    # profiling still shows exposed key DMA for small D.


def _infonce_explicit_kernel(a_ref, p_ref, n_ref, out_ref,
                             ascale_sc, pos_sc, m_sc, l_sc,
                             *, tau_inv, num_neg, tile_n, mask_pad):
    """negatives given branch: logits = [pos_sim, neg_sim...], label = 0.

    Grid = (num_b_tiles [parallel], num_n_chunks [arbitrary]); online
    logsumexp over N chunks so live f32 temporaries are bounded by the chunk.
    The D contraction stays on the VPU/XLU: each negative element is used
    exactly once, so this branch is HBM-bound, not MXU-bound.
    """
    ni = pl.program_id(1)
    nn = pl.num_programs(1)

    a32 = a_ref[...].astype(jnp.float32)                         # (TB, D)

    @pl.when(ni == 0)
    def _init():
        p32 = p_ref[...].astype(jnp.float32)
        a_inv = jax.lax.rsqrt(
            jnp.maximum(jnp.sum(a32 * a32, axis=1, keepdims=True), _EPS_SQ))
        p_inv = jax.lax.rsqrt(
            jnp.maximum(jnp.sum(p32 * p32, axis=1, keepdims=True), _EPS_SQ))
        a_scale = a_inv * tau_inv                                # (TB, 1)
        pos = jnp.sum(a32 * p32, axis=1, keepdims=True) * a_scale * p_inv
        ascale_sc[...] = a_scale
        pos_sc[...] = pos
        m_sc[...] = pos                                          # positive seeds LSE
        l_sc[...] = jnp.ones_like(l_sc)

    # One bounded (TB, TILE_N, D) f32 chunk; raw dot + sum-of-squares share it.
    neg32 = n_ref[...].astype(jnp.float32)
    raw = jnp.sum(neg32 * a32[:, None, :], axis=-1)              # (TB, TN)
    ss = jnp.sum(neg32 * neg32, axis=-1)                         # (TB, TN)
    sim = raw * jax.lax.rsqrt(jnp.maximum(ss, _EPS_SQ)) * ascale_sc[...]

    if mask_pad:                                                 # padded N columns
        col = ni * tile_n + jax.lax.broadcasted_iota(jnp.int32, sim.shape, 1)
        sim = jnp.where(col >= num_neg, _NEG_BIG, sim)

    m_prev = m_sc[...]
    m_new = jnp.maximum(m_prev, jnp.max(sim, axis=1, keepdims=True))
    alpha = jnp.exp(m_prev - m_new)
    l_sc[...] = alpha * l_sc[...] + jnp.sum(jnp.exp(sim - m_new), axis=1,
                                            keepdims=True)
    m_sc[...] = m_new

    @pl.when(ni == nn - 1)
    def _finalize():
        # cross_entropy(logits=[pos, neg...], label=0) = logsumexp(logits) - pos
        loss = m_sc[...] + jnp.log(l_sc[...]) - pos_sc[...]      # (TB, 1)
        out_ref[...] = jnp.broadcast_to(loss, out_ref.shape)     # lane-dense store


# ---------------------------------------------------------------------------
# Wrapper
# ---------------------------------------------------------------------------
class InfoNCELoss:
    """Pallas-TPU port of the PyTorch InfoNCELoss module."""

    def __init__(self, temperature: float = 0.1, reduction: str = "mean"):
        self.temperature = float(temperature)
        self.reduction = reduction

    def _per_sample_inbatch(self, anchor, positive):
        B, D = anchor.shape
        itemsize = jnp.dtype(anchor.dtype).itemsize
        limit, budget = _vmem_config()
        tq, tk, b_pad = _inbatch_tiling(B, D, itemsize, budget)

        if b_pad != B:
            pad = ((0, b_pad - B), (0, 0))
            anchor_p = jnp.pad(anchor, pad)
            positive_p = jnp.pad(positive, pad)
        else:
            anchor_p, positive_p = anchor, positive

        # Per-key inverse norms (keys == anchors), computed once and passed as a
        # tiny (1, b_pad) f32 row; applied in-kernel as a column post-scale.
        a32 = anchor_p.astype(jnp.float32)
        kinv = jax.lax.rsqrt(
            jnp.maximum(jnp.sum(a32 * a32, axis=1), _EPS_SQ)).reshape(1, b_pad)

        grid = (b_pad // tq, b_pad // tk)
        kernel = functools.partial(
            _infonce_inbatch_kernel,
            tau_inv=1.0 / self.temperature, batch=B,
            tile_q=tq, tile_k=tk, mask_pad=(b_pad != B))

        out = pl.pallas_call(
            kernel,
            out_shape=jax.ShapeDtypeStruct((b_pad, _OUT_LANES), jnp.float32),
            grid=grid,
            in_specs=[
                pl.BlockSpec((tq, D), lambda qi, ki: (qi, 0)),   # queries
                pl.BlockSpec((tq, D), lambda qi, ki: (qi, 0)),   # positives
                pl.BlockSpec((tk, D), lambda qi, ki: (ki, 0)),   # keys (raw dtype)
                pl.BlockSpec((1, tk), lambda qi, ki: (0, ki)),   # key inv-norms
            ],
            out_specs=pl.BlockSpec((tq, _OUT_LANES), lambda qi, ki: (qi, 0)),
            scratch_shapes=[pltpu.VMEM((tq, 1), jnp.float32)] * 4,
            compiler_params=pltpu.CompilerParams(
                dimension_semantics=("parallel", "arbitrary"),
                vmem_limit_bytes=limit),
        )(anchor_p, positive_p, anchor_p, kinv)
        return out[:B, 0]

    def _per_sample_explicit(self, anchor, positive, negatives):
        B, D = anchor.shape
        N = negatives.shape[1]
        itemsize = jnp.dtype(negatives.dtype).itemsize
        limit, budget = _vmem_config()
        tb, tn, b_pad, n_pad = _explicit_tiling(B, N, D, itemsize, budget)

        if b_pad != B:
            anchor_p = jnp.pad(anchor, ((0, b_pad - B), (0, 0)))
            positive_p = jnp.pad(positive, ((0, b_pad - B), (0, 0)))
        else:
            anchor_p, positive_p = anchor, positive
        if b_pad != B or n_pad != N:
            negatives_p = jnp.pad(negatives,
                                  ((0, b_pad - B), (0, n_pad - N), (0, 0)))
        else:
            negatives_p = negatives

        grid = (b_pad // tb, n_pad // tn)
        kernel = functools.partial(
            _infonce_explicit_kernel,
            tau_inv=1.0 / self.temperature, num_neg=N, tile_n=tn,
            mask_pad=(n_pad != N))

        out = pl.pallas_call(
            kernel,
            out_shape=jax.ShapeDtypeStruct((b_pad, _OUT_LANES), jnp.float32),
            grid=grid,
            in_specs=[
                pl.BlockSpec((tb, D), lambda bi, ni: (bi, 0)),
                pl.BlockSpec((tb, D), lambda bi, ni: (bi, 0)),
                pl.BlockSpec((tb, tn, D), lambda bi, ni: (bi, ni, 0)),
            ],
            out_specs=pl.BlockSpec((tb, _OUT_LANES), lambda bi, ni: (bi, 0)),
            scratch_shapes=[pltpu.VMEM((tb, 1), jnp.float32)] * 4,
            compiler_params=pltpu.CompilerParams(
                dimension_semantics=("parallel", "arbitrary"),
                vmem_limit_bytes=limit),
        )(anchor_p, positive_p, negatives_p)
        return out[:B, 0]

    def __call__(self, anchor, positive, negatives=None):
        if negatives is None:
            loss = self._per_sample_inbatch(anchor, positive)
        else:
            loss = self._per_sample_explicit(anchor, positive, negatives)

        if self.reduction == "mean":
            return jnp.mean(loss)
        elif self.reduction == "sum":
            return jnp.sum(loss)
        else:
            return loss


# ---------------------------------------------------------------------------
# Pure-JAX reference (mirrors the PyTorch code) for a correctness check.
# ---------------------------------------------------------------------------
def _ref_normalize(x):
    norm = jnp.sqrt(jnp.sum(x * x, axis=-1, keepdims=True))
    return x / jnp.maximum(norm, _EPS)


def _ref_infonce(anchor, positive, negatives, temperature, reduction):
    a = _ref_normalize(anchor.astype(jnp.float32))
    p = _ref_normalize(positive.astype(jnp.float32))
    pos_sim = jnp.sum(a * p, axis=1) / temperature
    if negatives is None:
        B = a.shape[0]
        sim = a @ a.T / temperature
        sim = jnp.where(jnp.eye(B, dtype=bool), pos_sim[:, None], sim)
        log_prob = jax.nn.log_softmax(sim, axis=1)
        loss = -jnp.diag(log_prob)
    else:
        n = _ref_normalize(negatives.astype(jnp.float32))
        neg_sim = jnp.einsum("bd,bnd->bn", a, n) / temperature
        logits = jnp.concatenate([pos_sim[:, None], neg_sim], axis=1)
        loss = jax.nn.logsumexp(logits, axis=1) - logits[:, 0]
    if reduction == "mean":
        return jnp.mean(loss)
    if reduction == "sum":
        return jnp.sum(loss)
    return loss


if __name__ == "__main__":
    key = jax.random.PRNGKey(0)

    def check(B, D, N, reduction):
        k_a, k_p, k_n = jax.random.split(
            jax.random.fold_in(key, 131 * B + D + 7 * N), 3)
        anchor = jax.random.normal(k_a, (B, D), dtype=jnp.float32)
        positive = jax.random.normal(k_p, (B, D), dtype=jnp.float32)
        negatives = jax.random.normal(k_n, (B, N, D), dtype=jnp.float32)
        loss_fn = InfoNCELoss(temperature=0.1, reduction=reduction)

        out_in = jax.block_until_ready(loss_fn(anchor, positive))
        ref_in = _ref_infonce(anchor, positive, None, 0.1, reduction)
        assert jnp.allclose(out_in, ref_in, atol=1e-4, rtol=1e-4), (
            "inbatch", B, out_in, ref_in)

        out_ex = jax.block_until_ready(loss_fn(anchor, positive, negatives))
        ref_ex = _ref_infonce(anchor, positive, negatives, 0.1, reduction)
        assert jnp.allclose(out_ex, ref_ex, atol=1e-4, rtol=1e-4), (
            "explicit", B, out_ex, ref_ex)

    check(8, 32, 4, "mean")      # tiny single-tile path
    check(20, 32, 4, "none")     # batch padded inside one tile (masking)
    check(96, 64, 6, "mean")     # two query/batch tiles (v7x megacore path)
    check(16, 16, 260, "mean")   # chunked-N online logsumexp + N padding mask
    print("KERNEL_OK")
</pallas_src>

<mosaic_0001>
module attributes {stable_mosaic.version = 11 : i64} {
  func.func @_infonce_inbatch_kernel(%arg0: i32, %arg1: i32, %arg2: memref<8x32xf32, #tpu.memory_space<vmem>>, %arg3: memref<8x32xf32, #tpu.memory_space<vmem>>, %arg4: memref<8x32xf32, #tpu.memory_space<vmem>>, %arg5: memref<1x8xf32, #tpu.memory_space<vmem>>, %arg6: memref<8x128xf32, #tpu.memory_space<vmem>>, %arg7: memref<8x1xf32, #tpu.memory_space<vmem>>, %arg8: memref<8x1xf32, #tpu.memory_space<vmem>>, %arg9: memref<8x1xf32, #tpu.memory_space<vmem>>, %arg10: memref<8x1xf32, #tpu.memory_space<vmem>>) attributes {dimension_semantics = [#tpu.dimension_semantics<parallel>, #tpu.dimension_semantics<arbitrary>], iteration_bounds = array<i64: 1, 1>, scalar_prefetch = 0 : i64, scratch_operands = 4 : i64, tpu.core_type = #tpu.core_type<tc>, window_params = [{transform_indices = @transform_0, window_bounds = array<i64: 8, 32>}, {transform_indices = @transform_1, window_bounds = array<i64: 8, 32>}, {transform_indices = @transform_2, window_bounds = array<i64: 8, 32>}, {transform_indices = @transform_3, window_bounds = array<i64: 1, 8>}, {transform_indices = @transform_4, window_bounds = array<i64: 8, 128>}]} {
    %c0_i32 = arith.constant 0 : i32
    %0 = arith.cmpi eq, %arg1, %c0_i32 : i32
    %1 = arith.extui %0 : i1 to i32
    %c0_i32_0 = arith.constant 0 : i32
    %2 = arith.cmpi ne, %1, %c0_i32_0 : i32
    scf.if %2 {
      %c0_22 = arith.constant 0 : index
      %c0_23 = arith.constant 0 : index
      %42 = vector.load %arg2[%c0_22, %c0_23] : memref<8x32xf32, #tpu.memory_space<vmem>>, vector<8x32xf32>
      %c0_24 = arith.constant 0 : index
      %c0_25 = arith.constant 0 : index
      %43 = vector.load %arg3[%c0_24, %c0_25] : memref<8x32xf32, #tpu.memory_space<vmem>>, vector<8x32xf32>
      %44 = arith.mulf %42, %42 : vector<8x32xf32>
      %cst_26 = arith.constant dense<0.000000e+00> : vector<8xf32>
      %45 = vector.multi_reduction <add>, %44, %cst_26 [1] : vector<8x32xf32> to vector<8xf32>
      %46 = vector.shape_cast %45 : vector<8xf32> to vector<8x1xf32>
      %cst_27 = arith.constant 1.000000e-24 : f32
      %47 = vector.broadcast %cst_27 : f32 to vector<8x1xf32>
      %48 = arith.maximumf %46, %47 : vector<8x1xf32>
      %49 = math.rsqrt %48 : vector<8x1xf32>
      %50 = arith.mulf %43, %43 : vector<8x32xf32>
      %cst_28 = arith.constant dense<0.000000e+00> : vector<8xf32>
      %51 = vector.multi_reduction <add>, %50, %cst_28 [1] : vector<8x32xf32> to vector<8xf32>
      %52 = vector.shape_cast %51 : vector<8xf32> to vector<8x1xf32>
      %cst_29 = arith.constant 1.000000e-24 : f32
      %53 = vector.broadcast %cst_29 : f32 to vector<8x1xf32>
      %54 = arith.maximumf %52, %53 : vector<8x1xf32>
      %55 = math.rsqrt %54 : vector<8x1xf32>
      %cst_30 = arith.constant 1.000000e+01 : f32
      %56 = vector.broadcast %cst_30 : f32 to vector<8x1xf32>
      %57 = arith.mulf %49, %56 : vector<8x1xf32>
      %58 = arith.mulf %42, %43 : vector<8x32xf32>
      %cst_31 = arith.constant dense<0.000000e+00> : vector<8xf32>
      %59 = vector.multi_reduction <add>, %58, %cst_31 [1] : vector<8x32xf32> to vector<8xf32>
      %60 = vector.shape_cast %59 : vector<8xf32> to vector<8x1xf32>
      %61 = arith.mulf %60, %57 : vector<8x1xf32>
      %62 = arith.mulf %61, %55 : vector<8x1xf32>
      %c0_32 = arith.constant 0 : index
      %c0_33 = arith.constant 0 : index
      %63 = vector.load %arg7[%c0_32, %c0_33] : memref<8x1xf32, #tpu.memory_space<vmem>>, vector<8x1xf32>
      tpu.vector_store %arg7[%c0_32, %c0_33], %57 {strides = array<i32>} : memref<8x1xf32, #tpu.memory_space<vmem>>, vector<8x1xf32>,
      %c0_34 = arith.constant 0 : index
      %c0_35 = arith.constant 0 : index
      %64 = vector.load %arg8[%c0_34, %c0_35] : memref<8x1xf32, #tpu.memory_space<vmem>>, vector<8x1xf32>
      tpu.vector_store %arg8[%c0_34, %c0_35], %62 {strides = array<i32>} : memref<8x1xf32, #tpu.memory_space<vmem>>, vector<8x1xf32>,
      %c0_36 = arith.constant 0 : index
      %c0_37 = arith.constant 0 : index
      %65 = vector.load %arg9[%c0_36, %c0_37] : memref<8x1xf32, #tpu.memory_space<vmem>>, vector<8x1xf32>
      tpu.vector_store %arg9[%c0_36, %c0_37], %62 {strides = array<i32>} : memref<8x1xf32, #tpu.memory_space<vmem>>, vector<8x1xf32>,
      %cst_38 = arith.constant 1.000000e+00 : f32
      %66 = vector.broadcast %cst_38 : f32 to vector<8x1xf32>
      %c0_39 = arith.constant 0 : index
      %c0_40 = arith.constant 0 : index
      %67 = vector.load %arg10[%c0_39, %c0_40] : memref<8x1xf32, #tpu.memory_space<vmem>>, vector<8x1xf32>
      tpu.vector_store %arg10[%c0_39, %c0_40], %66 {strides = array<i32>} : memref<8x1xf32, #tpu.memory_space<vmem>>, vector<8x1xf32>,
    } else {
    }
    %c0 = arith.constant 0 : index
    %c0_1 = arith.constant 0 : index
    %3 = vector.load %arg2[%c0, %c0_1] : memref<8x32xf32, #tpu.memory_space<vmem>>, vector<8x32xf32>
    %c0_2 = arith.constant 0 : index
    %c0_3 = arith.constant 0 : index
    %4 = vector.load %arg4[%c0_2, %c0_3] : memref<8x32xf32, #tpu.memory_space<vmem>>, vector<8x32xf32>
    %cst = arith.constant dense<0.000000e+00> : vector<8x8xf32>
    %5 = tpu.matmul %3, %4, %cst {dimension_numbers = #tpu.dot_dimension_numbers<[1], [1], [0], [0], [0, 0, 1, 0], [], []>} : vector<8x32xf32>, vector<8x32xf32>, vector<8x8xf32> -> vector<8x8xf32>
    %c0_4 = arith.constant 0 : index
    %c0_5 = arith.constant 0 : index
    %6 = vector.load %arg7[%c0_4, %c0_5] : memref<8x1xf32, #tpu.memory_space<vmem>>, vector<8x1xf32>
    %7 = vector.broadcast %6 : vector<8x1xf32> to vector<8x8xf32>
    %8 = arith.mulf %5, %7 : vector<8x8xf32>
    %c0_6 = arith.constant 0 : index
    %c0_7 = arith.constant 0 : index
    %9 = vector.load %arg5[%c0_6, %c0_7] : memref<1x8xf32, #tpu.memory_space<vmem>>, vector<1x8xf32>
    %10 = vector.broadcast %9 : vector<1x8xf32> to vector<8x8xf32>
    %11 = arith.mulf %8, %10 : vector<8x8xf32>
    %c8_i32 = arith.constant 8 : i32
    %12 = arith.muli %arg0, %c8_i32 : i32
    %13 = tpu.iota {dimensions = array<i32: 0>} : vector<8x8xi32>
    %14 = vector.broadcast %12 : i32 to vector<8x8xi32>
    %15 = arith.addi %14, %13 : vector<8x8xi32>
    %c8_i32_8 = arith.constant 8 : i32
    %16 = arith.muli %arg1, %c8_i32_8 : i32
    %17 = tpu.iota {dimensions = array<i32: 1>} : vector<8x8xi32>
    %18 = vector.broadcast %16 : i32 to vector<8x8xi32>
    %19 = arith.addi %18, %17 : vector<8x8xi32>
    %20 = arith.cmpi eq, %15, %19 : vector<8x8xi32>
    %cst_9 = arith.constant -1.000000e+30 : f32
    %21 = vector.broadcast %cst_9 : f32 to vector<8x8xf32>
    %22 = arith.select %20, %21, %11 : vector<8x8xi1>, vector<8x8xf32>
    %c0_10 = arith.constant 0 : index
    %c0_11 = arith.constant 0 : index
    %23 = vector.load %arg9[%c0_10, %c0_11] : memref<8x1xf32, #tpu.memory_space<vmem>>, vector<8x1xf32>
    %cst_12 = arith.constant dense<0xFF800000> : vector<8xf32>
    %24 = vector.multi_reduction <maximumf>, %22, %cst_12 [1] : vector<8x8xf32> to vector<8xf32>
    %25 = vector.shape_cast %24 : vector<8xf32> to vector<8x1xf32>
    %26 = arith.maximumf %23, %25 : vector<8x1xf32>
    %27 = arith.subf %23, %26 : vector<8x1xf32>
    %28 = math.exp %27 : vector<8x1xf32>
    %c0_13 = arith.constant 0 : index
    %c0_14 = arith.constant 0 : index
    %29 = vector.load %arg10[%c0_13, %c0_14] : memref<8x1xf32, #tpu.memory_space<vmem>>, vector<8x1xf32>
    %30 = arith.mulf %28, %29 : vector<8x1xf32>
    %31 = vector.broadcast %26 : vector<8x1xf32> to vector<8x8xf32>
    %32 = arith.subf %22, %31 : vector<8x8xf32>
    %33 = math.exp %32 : vector<8x8xf32>
    %cst_15 = arith.constant dense<0.000000e+00> : vector<8xf32>
    %34 = vector.multi_reduction <add>, %33, %cst_15 [1] : vector<8x8xf32> to vector<8xf32>
    %35 = vector.shape_cast %34 : vector<8xf32> to vector<8x1xf32>
    %36 = arith.addf %30, %35 : vector<8x1xf32>
    %c0_16 = arith.constant 0 : index
    %c0_17 = arith.constant 0 : index
    %37 = vector.load %arg10[%c0_16, %c0_17] : memref<8x1xf32, #tpu.memory_space<vmem>>, vector<8x1xf32>
    tpu.vector_store %arg10[%c0_16, %c0_17], %36 {strides = array<i32>} : memref<8x1xf32, #tpu.memory_space<vmem>>, vector<8x1xf32>,
    %c0_18 = arith.constant 0 : index
    %c0_19 = arith.constant 0 : index
    %38 = vector.load %arg9[%c0_18, %c0_19] : memref<8x1xf32, #tpu.memory_space<vmem>>, vector<8x1xf32>
    tpu.vector_store %arg9[%c0_18, %c0_19], %26 {strides = array<i32>} : memref<8x1xf32, #tpu.memory_space<vmem>>, vector<8x1xf32>,
    %c0_i32_20 = arith.constant 0 : i32
    %39 = arith.cmpi eq, %arg1, %c0_i32_20 : i32
    %40 = arith.extui %39 : i1 to i32
    %c0_i32_21 = arith.constant 0 : i32
    %41 = arith.cmpi ne, %40, %c0_i32_21 : i32
    scf.if %41 {
      %c0_22 = arith.constant 0 : index
      %c0_23 = arith.constant 0 : index
      %42 = vector.load %arg9[%c0_22, %c0_23] : memref<8x1xf32, #tpu.memory_space<vmem>>, vector<8x1xf32>
      %c0_24 = arith.constant 0 : index
      %c0_25 = arith.constant 0 : index
      %43 = vector.load %arg10[%c0_24, %c0_25] : memref<8x1xf32, #tpu.memory_space<vmem>>, vector<8x1xf32>
      %44 = math.log %43 : vector<8x1xf32>
      %45 = arith.addf %42, %44 : vector<8x1xf32>
      %c0_26 = arith.constant 0 : index
      %c0_27 = arith.constant 0 : index
      %46 = vector.load %arg8[%c0_26, %c0_27] : memref<8x1xf32, #tpu.memory_space<vmem>>, vector<8x1xf32>
      %47 = arith.subf %45, %46 : vector<8x1xf32>
      %48 = vector.shape_cast %47 : vector<8x1xf32> to vector<8x1xf32>
      %49 = vector.broadcast %48 : vector<8x1xf32> to vector<8x128xf32>
      %c0_28 = arith.constant 0 : index
      %c0_29 = arith.constant 0 : index
      %50 = vector.load %arg6[%c0_28, %c0_29] : memref<8x128xf32, #tpu.memory_space<vmem>>, vector<8x128xf32>
      tpu.vector_store %arg6[%c0_28, %c0_29], %49 {strides = array<i32>} : memref<8x128xf32, #tpu.memory_space<vmem>>, vector<8x128xf32>,
    } else {
    }
    return
  }
  func.func @transform_0(%arg0: i32, %arg1: i32) -> (i32, i32) {
    %c0_i32 = arith.constant 0 : i32
    %c0_i32_0 = arith.constant 0 : i32
    return %arg0, %c0_i32 : i32, i32
  }
  func.func @transform_1(%arg0: i32, %arg1: i32) -> (i32, i32) {
    %c0_i32 = arith.constant 0 : i32
    %c0_i32_0 = arith.constant 0 : i32
    return %arg0, %c0_i32 : i32, i32
  }
  func.func @transform_2(%arg0: i32, %arg1: i32) -> (i32, i32) {
    %c0_i32 = arith.constant 0 : i32
    %c0_i32_0 = arith.constant 0 : i32
    return %arg1, %c0_i32 : i32, i32
  }
  func.func @transform_3(%arg0: i32, %arg1: i32) -> (i32, i32) {
    %c0_i32 = arith.constant 0 : i32
    %c0_i32_0 = arith.constant 0 : i32
    return %c0_i32, %arg1 : i32, i32
  }
  func.func @transform_4(%arg0: i32, %arg1: i32) -> (i32, i32) {
    %c0_i32 = arith.constant 0 : i32
    %c0_i32_0 = arith.constant 0 : i32
    return %arg0, %c0_i32 : i32, i32
  }
}

</mosaic_0001>

<bundles_post_ra>
// kernel: tpu_custom_call.1
= control target key start
LH: loop header
LB: loop body
LE: loop exit
PB: predicated region body
PF: predicated region fallthrough
CT: control target
= control target key end

     0   :  { %9 = vsyncpa [#allocation7], 0  ;;  %s464_s0 = inlined_call_operand.hbm [shape: f32[8,32], index: 0, kind: input, shape index: {}]   ;;  %s465_s1 = inlined_call_operand.hbm [shape: f32[8,32], index: 1, kind: input, shape index: {}]   ;;  %s466_s2 = inlined_call_operand.hbm [shape: f32[8,32], index: 2, kind: input, shape index: {}]   ;;  %s467_s3 = inlined_call_operand.vmem [shape: f32[1,8], index: 3, kind: input, shape index: {}]   ;;  %s468_s4 = inlined_call_operand.hbm [shape: f32[8,128], index: 4, kind: output, shape index: {}]  }
   0x1   :  { %10 = vsyncpa [#allocation10], 0 }
   0x2   :  { %11 = vsyncpa [#allocation8], 0  ;;  %s372_s15 = smov [#allocation9]   ;;  %s373_s17 = smov [#allocation6]  }
   0x3   :  { %s28_s16 = sshll.u32 %s372_s15, 4  ;;  %s18_s18 = sshll.u32 %s373_s17, 4  ;;  %s29_s16 = int_to_ptr.vmem [resolvable:$true] %s28_s16  ;;  %s19_s18 = int_to_ptr.vmem [resolvable:$true] %s18_s18 }
   0x4   :  { %s278_s21 = scalar_lea.hbm %s465_s1, 128 }
   0x5   :  { %p279_p0 = scmp.ne.s32.totalorder %s465_s1, %s278_s21  ;;  %p282_p1 = scmp.lt.u32.totalorder %s278_s21, %s465_s1 }
   0x7   :  { %p284_p2 = pnand %p282_p1, %p279_p0 }
   0x9   :  { %287 = shalt.err (!%p284_p2)
}
   0xa   :  { %s288_s26 = scalar_lea.vmem %s29_s16, 128  ;;  %p293_p4 = scmp.lt.s32.totalorder %s29_s16, %s29_s16 }
   0xb   :  { %p289_p3 = scmp.ne.s32.totalorder %s29_s16, %s288_s26  ;;  %p294_p5 = scmp.lt.s32.totalorder %s288_s26, %s288_s26 }
   0xd   :  { %p295_p6 = por %p294_p5, %p293_p4 }
   0xf   :  { %p296_p7 = pnand %p295_p6, %p289_p3 }
  0x11   :  { %299 = shalt.err (!%p296_p7)
}
  0x12   :  { %31 = dma.hbm_to_vmem [thread:$0]  %s465_s1, 128, %s29_s16, [#allocation10]  }
  0x13   :  { %s300_s5 = scalar_lea.hbm %s464_s0, 128 }
  0x14   :  { %p301_p8 = scmp.ne.s32.totalorder %s464_s0, %s300_s5  ;;  %p304_p9 = scmp.lt.u32.totalorder %s300_s5, %s464_s0 }
  0x16   :  { %p306_p10 = pnand %p304_p9, %p301_p8 }
  0x18   :  { %309 = shalt.err (!%p306_p10)
}
  0x19   :  { %s310_s10 = scalar_lea.vmem %s19_s18, 128  ;;  %p315_p12 = scmp.lt.s32.totalorder %s19_s18, %s19_s18 }
  0x1a   :  { %p311_p11 = scmp.ne.s32.totalorder %s19_s18, %s310_s10  ;;  %p316_p13 = scmp.lt.s32.totalorder %s310_s10, %s310_s10 }
  0x1c   :  { %p317_p0 = por %p316_p13, %p315_p12 }
  0x1e   :  { %p318_p1 = pnand %p317_p0, %p311_p11 }
  0x20   :  { %321 = shalt.err (!%p318_p1)
}
  0x21   :  { %21 = dma.hbm_to_vmem [thread:$0]  %s464_s0, 128, %s19_s18, [#allocation7]  }
  0x22   :  { %s374_s12 = smov [#allocation11]   ;;  %s322_s16 = scalar_lea.hbm %s466_s2, 128 }
  0x23   :  { %s38_s13 = sshll.u32 %s374_s12, 4  ;;  %p323_p2 = scmp.ne.s32.totalorder %s466_s2, %s322_s16  ;;  %s39_s13 = int_to_ptr.vmem [resolvable:$true] %s38_s13 }
  0x24   :  { %p326_p3 = scmp.lt.u32.totalorder %s322_s16, %s466_s2 }
  0x26   :  { %p328_p4 = pnand %p326_p3, %p323_p2 }
  0x28   :  { %331 = shalt.err (!%p328_p4)
}
  0x29   :  { %s332_s22 = scalar_lea.vmem %s39_s13, 128  ;;  %p337_p6 = scmp.lt.s32.totalorder %s39_s13, %s39_s13 }
  0x2a   :  { %p333_p5 = scmp.ne.s32.totalorder %s39_s13, %s332_s22  ;;  %p338_p7 = scmp.lt.s32.totalorder %s332_s22, %s332_s22 }
  0x2c   :  { %p339_p8 = por %p338_p7, %p337_p6 }
  0x2e   :  { %p340_p9 = pnand %p339_p8, %p333_p5 }
  0x30   :  { %343 = shalt.err (!%p340_p9)
}
  0x31   :  { %41 = dma.hbm_to_vmem [thread:$0]  %s466_s2, 128, %s39_s13, [#allocation10]  }
  0x32   :  { %366 = dma.done.wait [#allocation7], 128  }
  0x33   :  { %367 = vsyncadd [#allocation7], 4294967168 }
  0x34   :  { %368 = dma.done.wait [#allocation10], 256  }
  0x35   :  { %369 = vsyncadd [#allocation10], 4294967040  ;;  %v375_v0 = vmov 0.0   ;;  %vm376_vm0 = vmmov 0   ;;  %v57_v1 = vld [vmem:[#allocation6] sm:$0xff]  ;;  %vm60_vm1 = vcmask 261120   ;;  %v179_v24 = vlaneseq }
  0x36   :  { %253 = vmatprep.subr.mxu0 %v375_v0  ;;  %255 = vmatprep.mubr.msk.f32.mxu0 %vm376_vm0, %v375_v0  ;;  %v58_v2 = vld [vmem:[#allocation9] sm:$0xff]  ;;  %v85_v3 = vld [vmem:[#allocation11] sm:$0xff]  ;;  %v59_v4 = vmul.f32 %v57_v1, %v57_v1  ;;  %v377_v10 = vmov 0   ;;  %vm79_vm2 = vcmask 7168   ;;  %v250_v27 = vld [vmem:[%s467_s3] ss:$0 sm:$0xff] }
  0x37   :  { %v66_v5 = vmul.f32 %v58_v2, %v58_v2  ;;  %v73_v6 = vmul.f32 %v58_v2, %v57_v1  ;;  %254 = vmatpush3.xpose.msk.msra.mxu0 %vm60_vm1, %v85_v3  ;;  %266 = vset.pattern.permute.xlu0 %v377_v10  ;;  %v180_v25 = vshrl.u32 %v179_v24, 7  ;;  %v185_v26 = vand.u32 127, %v179_v24  ;;  %s379_s3 = smov [#allocation12]  }
  0x38   :  { %v61_v7 = vsel %vm60_vm1, %v59_v4, 0.0  ;;  %267 = vset.pattern.permute.xlu1 %v377_v10  ;;  %vm191_vm4 = vcmask 64512   ;;  %v378_v33 = vmov 1.0   ;;  %s238_s24 = sshll.u32 %s379_s3, 4  ;;  %s239_s24 = int_to_ptr.vmem [resolvable:$true] %s238_s24 }
  0x39   :  { %v67_v8 = vsel %vm60_vm1, %v66_v5, 0.0  ;;  %62 = vadd.xlane.f32.xlu0 %v61_v7  ;;  %v74_v9 = vsel %vm60_vm1, %v73_v6, 0.0  ;;  %vm188_vm3 = vcmp.eq.s32.totalorder %v180_v25, %v185_v26  ;;  %83 = vst.msk [vmem:[#allocation5] sm:$0xff] %vm79_vm2, %v378_v33  ;;  %s344_s25 = scalar_lea.vmem %s239_s24, 128  ;;  %p349_p11 = scmp.lt.s32.totalorder %s239_s24, %s239_s24 }
  0x3a   :  { %68 = vadd.xlane.f32.xlu1 %v67_v8  ;;  %256 = vmatmul.mubr.msk.f32.vlgmr.msra.gmra.mrb[0].mxu0 %vm60_vm1, %v57_v1  ;;  %p345_p10 = scmp.ne.s32.totalorder %s239_s24, %s344_s25  ;;  %p350_p12 = scmp.lt.s32.totalorder %s344_s25, %s344_s25 }
  0x3c   :  { %p351_p13 = por %p350_p12, %p349_p11 }
  0x3e   :  { %75 = vadd.xlane.f32.xlu1 %v74_v9  ;;  %p352_p0 = pnand %p351_p13, %p345_p10 }
  0x40   :  { %v199_v45 = vld [vmem:[#allocation5] sm:$0xff] }
  0xc6   :  { %v63_v11 = vpop.xlane.xlu0 %62 }
  0xc7   :  { %v69_v12 = vpop.xlane.xlu1 %68  ;;  %v64_v13 = vmax.f32 %v63_v11, 1e-24 }
  0xc8   :  { %v70_v14 = vmax.f32 %v69_v12, 1e-24 }
  0xc9   :  { %268 = vrsqrt.f32 %v64_v13 }
  0xca   :  { %270 = vrsqrt.f32 %v70_v14 }
  0xcb   :  { %v76_v16 = vpop.xlane.xlu1 %75 }
  0xd3   :  { %v269_v15 = vpop.eup %268 }
  0xd4   :  { %v72_v17 = vmul.f32 10.0, %v269_v15  ;;  %v271_v18 = vpop.eup %270 }
  0xd6   :  { %v77_v19 = vmul.f32 %v76_v16, %v72_v17  ;;  %80 = vst.msk [vmem:[#allocation2] sm:$0xff] %vm79_vm2, %v72_v17 }
  0xd8   :  { %v78_v20 = vmul.f32 %v271_v18, %v77_v19 }
  0xda   :  { %81 = vst.msk [vmem:[#allocation3] sm:$0xff] %vm79_vm2, %v78_v20  ;;  %82 = vst.msk [vmem:[#allocation4] sm:$0xff] %vm79_vm2, %v78_v20 }
  0xdd   :  { %v163_v21 = vld [vmem:[#allocation2] sm:$0xff] }
  0xde   :  { %166 = vperm.xlu0 %266, %v163_v21  }
  0xe1   :  { %v190_v35 = vld [vmem:[#allocation4] sm:$0xff]  ;;  %v224_v54 = vld [vmem:[#allocation3] sm:$0xff] }
 0x10d   :  { %v159_v22 = vpop.f32.mrb[0].mxu0 }
 0x10e   :  { %v257_v23 = vpop.f32.mrb[1].mxu0 }
 0x15d   :  { %v167_v28 = vpop.permute.xlu0 %166 }
 0x15e   :  { %v169_v29 = vmul.f32 %v167_v28, %v159_v22 }
 0x160   :  { %v177_v30 = vmul.f32 %v250_v27, %v169_v29 }
 0x162   :  { %v189_v31 = vsel %vm188_vm3, -1e+30, %v177_v30 }
 0x163   :  { %v192_v32 = vsel %vm191_vm4, %v189_v31, -inf }
 0x164   :  { %193 = vmax.xlane.f32.xlu1 %v192_v32 }
 0x1f1   :  { %v194_v34 = vpop.xlane.xlu1 %193 }
 0x1f2   :  { %v195_v36 = vmax.f32 %v190_v35, %v194_v34 }
 0x1f4   :  { %v196_v37 = vsub.f32 %v190_v35, %v195_v36  ;;  %215 = vst.msk [vmem:[#allocation4] sm:$0xff] %vm79_vm2, %v195_v36  ;;  %203 = vperm.xlu1 %267, %v195_v36  }
 0x1f6   :  { %v197_v43 = vmul.f32 1.442695, %v196_v37 }
 0x1fb   :  { %v219_v52 = vld [vmem:[#allocation4] sm:$0xff] }
 0x273   :  { %v204_v38 = vpop.permute.xlu1 %203 }
 0x274   :  { %v206_v39 = vsub.f32 %v189_v31, %v204_v38 }
 0x276   :  { %v207_v40 = vmul.f32 1.442695, %v206_v39 }
 0x278   :  { %272 = vpow2.f32 %v207_v40 }
 0x279   :  { %274 = vpow2.f32 %v197_v43 }
 0x282   :  { %v273_v41 = vpop.eup %272 }
 0x283   :  { %v209_v42 = vsel %vm191_vm4, %v273_v41, 0.0  ;;  %v275_v44 = vpop.eup %274 }
 0x284   :  { %210 = vadd.xlane.f32.xlu1 %v209_v42  ;;  %v200_v46 = vmul.f32 %v275_v44, %v199_v45 }
 0x311   :  { %v211_v47 = vpop.xlane.xlu1 %210 }
 0x312   :  { %v212_v48 = vadd.f32 %v211_v47, %v200_v46 }
 0x314   :  { %214 = vst.msk [vmem:[#allocation5] sm:$0xff] %vm79_vm2, %v212_v48 }
 0x31b   :  { %v220_v49 = vld [vmem:[#allocation5] sm:$0xff] }
 0x31c   :  { %276 = vlog2.f32 %v220_v49 }
 0x326   :  { %v277_v50 = vpop.eup %276 }
 0x327   :  { %v222_v51 = vmul.f32 0.6931472, %v277_v50 }
 0x329   :  { %v223_v53 = vadd.f32 %v222_v51, %v219_v52 }
 0x32b   :  { %v225_v55 = vsub.f32 %v223_v53, %v224_v54 }
 0x32d   :  { %228 = vperm.xlu0 %266, %v225_v55  }
 0x3ac   :  { %v229_v56 = vpop.permute.xlu0 %228 }
 0x3ad   :  { %231 = vst [vmem:[#allocation12] sm:$0xff] %v229_v56 }
 0x3ae   :  { %355 = shalt.err (!%p352_p0)
}
 0x3af   :  { %s356_s28 = scalar_lea.hbm %s468_s4, 128 }
 0x3b0   :  { %p357_p1 = scmp.ne.s32.totalorder %s468_s4, %s356_s28  ;;  %p360_p2 = scmp.lt.u32.totalorder %s356_s28, %s468_s4 }
 0x3b2   :  { %p362_p3 = pnand %p360_p2, %p357_p1 }
 0x3b4   :  { %365 = shalt.err (!%p362_p3)
}
 0x3b5   :  { %241 = dma.vmem_to_hbm [thread:$0]  %s239_s24, 128, %s468_s4, [#allocation8]  }
 0x3b6   :  { %370 = dma.done.wait [#allocation8], 128  }
 0x3b7   :  { %371 = vsyncadd [#allocation8], 4294967168 }
 0x3b8   :  { %245 = vsyncpa [#allocation7], 1 }
 0x3b9   :  { %246 = vsyncpa [#allocation10], 1 }
 0x3ba   :  { %247 = vsyncpa [#allocation8], 1 }

</bundles_post_ra>
